<compile_context>
chip_gen: v6e
topology: v6e:2x2x1
jax: 0.10.0
libtpu: 0.0.40
codegen_flags: <defaults>
</compile_context>

<pallas_src>
import functools

import jax
import jax.numpy as jnp
from jax.experimental import pallas as pl
from jax.experimental.pallas import tpu as pltpu


def _round_up(n, m):
    return ((n + m - 1) // m) * m


# --------------------------------------------------------------------------- #
# Pallas kernel (everything transposed: batch is the lane axis)
#   h1 = relu(P @ multi_hot + W1n @ bn_num(x_num) + b1)
#   h2 = relu(W2f @ h1 + b2f)                (BN1 folded into W2f/b2f)
#   y  = sigmoid(sum(h2 * wo, axis=0) + bo)  (BN2 folded into wo/bo)
# --------------------------------------------------------------------------- #
def mlp_kernel(ids_ref, xnum_ref, p_ref, w1n_ref, sn_ref, shn_ref,
               b1_ref, w2_ref, b2_ref, wo_ref, bo_ref, o_ref, *, offsets):
    total_pad = p_ref.shape[1]
    tb = ids_ref.shape[1]
    mm_dtype = p_ref.dtype

    # ---- fused embedding gather + layer-1 matmul ---------------------------
    ids = ids_ref[...]                                            # (n_feats, tb) i32
    rows = jax.lax.broadcasted_iota(jnp.int32, (total_pad, tb), 0)
    hit = None
    for f, off in enumerate(offsets):                             # static unroll
        eq = rows == (ids[f:f + 1, :] + off)
        hit = eq if hit is None else jnp.logical_or(hit, eq)
    hot = hit.astype(jnp.float32).astype(mm_dtype)                # (total_pad, tb)
    h = jnp.dot(p_ref[...], hot,
                preferred_element_type=jnp.float32)               # (h1_p, tb)

    # ---- numerical features: BatchNorm in f32, then numerical rows of W1 ---
    x2 = xnum_ref[...] * sn_ref[...] + shn_ref[...]               # (num_p, tb) f32
    h = h + jnp.dot(w1n_ref[...], x2.astype(mm_dtype),
                    preferred_element_type=jnp.float32)
    h = jnp.maximum(h + b1_ref[...], 0.0)                         # ReLU (h1_p, tb)

    # ---- hidden layer 2 (BN1 folded forward into W2/b2) --------------------
    h = jnp.dot(w2_ref[...], h.astype(mm_dtype),
                preferred_element_type=jnp.float32) + b2_ref[...]
    h = jnp.maximum(h, 0.0)                                       # (h2_p, tb)

    # ---- output layer (N=1, BN2 folded into wo/bo) -------------------------
    # VPU multiply + cross-sublane reduce; result is already lane-dense (1, tb)
    z = jnp.sum(h * wo_ref[...], axis=0, keepdims=True) + bo_ref[...]
    o_ref[...] = jax.nn.sigmoid(z)


def mlp_pallas(ids_t, xnum_t, kp, *, tb):
    n_feats, b_pad = ids_t.shape
    num_p = xnum_t.shape[0]
    assert b_pad % tb == 0
    h1_p, total_pad = kp["P"].shape
    h2_p = kp["W2"].shape[0]

    resident = lambda i: (0, 0)       # weights: constant block index -> DMA'd once
    kernel = functools.partial(mlp_kernel, offsets=kp["offsets"])

    flops = 2 * b_pad * (h1_p * total_pad + h1_p * num_p + h2_p * h1_p + h2_p)
    bytes_accessed = (ids_t.size * 4 + xnum_t.size * 4 + b_pad * 4
                      + sum(int(kp[k].size) * kp[k].dtype.itemsize
                            for k in ("P", "W1n", "sn", "shn", "b1",
                                      "W2", "b2", "wo", "bo")))

    # NOTE: at tb=2048 the whole working set is a few MiB, far below the 32 MiB
    # default scoped VMEM on all gens; re-budget vmem_limit_bytes if hidden
    # dims or tb grow (v7x has only 64 MiB physical VMEM).
    return pl.pallas_call(
        kernel,
        out_shape=jax.ShapeDtypeStruct((1, b_pad), jnp.float32),
        grid_spec=pltpu.PrefetchScalarGridSpec(
            num_scalar_prefetch=0,
            grid=(b_pad // tb,),
            in_specs=[
                pl.BlockSpec((n_feats, tb), lambda i: (0, i)),    # streamed ids
                pl.BlockSpec((num_p, tb), lambda i: (0, i)),      # streamed numerics
                pl.BlockSpec(kp["P"].shape, resident),            # resident weights
                pl.BlockSpec(kp["W1n"].shape, resident),
                pl.BlockSpec(kp["sn"].shape, resident),
                pl.BlockSpec(kp["shn"].shape, resident),
                pl.BlockSpec(kp["b1"].shape, resident),
                pl.BlockSpec(kp["W2"].shape, resident),
                pl.BlockSpec(kp["b2"].shape, resident),
                pl.BlockSpec(kp["wo"].shape, resident),
                pl.BlockSpec(kp["bo"].shape, resident),
            ],
            out_specs=pl.BlockSpec((1, tb), lambda i: (0, i)),    # lane-dense out
        ),
        compiler_params=pltpu.CompilerParams(
            dimension_semantics=("parallel",)),
        cost_estimate=pl.CostEstimate(flops=int(flops),
                                      transcendentals=int(b_pad),
                                      bytes_accessed=int(bytes_accessed)),
    )(ids_t, xnum_t, kp["P"], kp["W1n"], kp["sn"], kp["shn"],
      kp["b1"], kp["W2"], kp["b2"], kp["wo"], kp["bo"])


# --------------------------------------------------------------------------- #
# Parameter construction (deterministic, mirrors the module's __init__ shapes)
# --------------------------------------------------------------------------- #
def fold_bn(gamma, beta, mean, var, eps=1e-5):
    scale = gamma / jnp.sqrt(var + eps)
    shift = beta - mean * scale
    return scale, shift


def init_params(key, n_customers, n_products, keys_dim, cat_dims,
                numerical_dim, hidden_dim):
    ks = iter(jax.random.split(key, 64))
    p = {}

    # embeddings: uniform(-0.01, 0.01) as in create_embedding_layer
    p["cust_emb"] = jax.random.uniform(next(ks), (n_customers, keys_dim),
                                       jnp.float32, -0.01, 0.01)
    p["prod_emb"] = jax.random.uniform(next(ks), (n_products, keys_dim),
                                       jnp.float32, -0.01, 0.01)
    p["cat_embs"] = [jax.random.uniform(next(ks), (n, d), jnp.float32, -0.01, 0.01)
                     for (n, d) in cat_dims]

    cat_total = sum(d for (_, d) in cat_dims)
    d_in = keys_dim * 2 + cat_total + numerical_dim

    def kaiming(k, fan_in, fan_out):
        # kaiming_normal on [out, in]; stored transposed as [in, out]
        return (jax.random.normal(k, (fan_in, fan_out), jnp.float32)
                * jnp.sqrt(2.0 / fan_in))

    dims = [d_in] + list(hidden_dim)
    p["W"], p["b"] = [], []
    for i in range(len(hidden_dim)):
        p["W"].append(kaiming(next(ks), dims[i], dims[i + 1]))
        p["b"].append(jax.random.uniform(next(ks), (1, dims[i + 1]),
                                         jnp.float32, -0.05, 0.05))
    p["Wo"] = kaiming(next(ks), hidden_dim[-1], 1)
    p["bo"] = jax.random.uniform(next(ks), (1, 1), jnp.float32, -0.05, 0.05)

    # BatchNorm1d per hidden layer (inference-mode running stats)
    p["bn_scale"], p["bn_shift"] = [], []
    for h in hidden_dim:
        gamma = jax.random.uniform(next(ks), (1, h), jnp.float32, 0.5, 1.5)
        beta = 0.1 * jax.random.normal(next(ks), (1, h), jnp.float32)
        mean = 0.1 * jax.random.normal(next(ks), (1, h), jnp.float32)
        var = jax.random.uniform(next(ks), (1, h), jnp.float32, 0.5, 1.5)
        s, sh = fold_bn(gamma, beta, mean, var)
        p["bn_scale"].append(s)
        p["bn_shift"].append(sh)

    # BatchNorm1d for the numerical features
    gamma = jax.random.uniform(next(ks), (1, numerical_dim), jnp.float32, 0.5, 1.5)
    beta = 0.1 * jax.random.normal(next(ks), (1, numerical_dim), jnp.float32)
    mean = 0.1 * jax.random.normal(next(ks), (1, numerical_dim), jnp.float32)
    var = jax.random.uniform(next(ks), (1, numerical_dim), jnp.float32, 0.5, 1.5)
    p["bn_num_scale"], p["bn_num_shift"] = fold_bn(gamma, beta, mean, var)
    return p


def prepare_kernel_params(p, numerical_dim, *, mm_dtype=jnp.bfloat16):
    """Pre-project embedding tables through layer-1, fold hidden BNs forward,
    transpose + pad everything into lane-friendly shapes for the kernel."""
    W1, W2 = p["W"]                      # (d_in, h1), (h1, h2)
    b1, b2 = p["b"]                      # (1, h1),   (1, h2)
    s1, sh1 = p["bn_scale"][0], p["bn_shift"][0]
    s2, sh2 = p["bn_scale"][1], p["bn_shift"][1]
    Wo, bo = p["Wo"], p["bo"]            # (h2, 1), (1, 1)
    sn, shn = p["bn_num_scale"], p["bn_num_shift"]   # (1, num_dim)

    d_in, h1 = W1.shape
    h2 = W2.shape[1]
    d_emb = d_in - numerical_dim

    # (a) Fuse embedding gather + layer-1: P[off_t + r, :] = table_t[r] @ W1[seg_t]
    tables = [p["cust_emb"], p["prod_emb"]] + list(p["cat_embs"])
    segs, offsets, col, row = [], [], 0, 0
    for t in tables:
        d = t.shape[1]
        segs.append(t @ W1[col:col + d, :])          # f32 projection
        offsets.append(row)
        col += d
        row += t.shape[0]
    assert col == d_emb
    P = jnp.concatenate(segs, axis=0)                # (n_rows_total, h1)
    total_pad = _round_up(row, 128)

    # (b) numerical rows of W1 kept separate; numerical BN applied in-kernel (f32)
    W1n = W1[d_emb:, :]                              # (num_dim, h1)

    # (c) hidden BN (module order Linear -> ReLU -> BN) folded into next Linear
    W2f = W2 * s1.reshape(-1, 1)
    b2f = b2 + sh1 @ W2
    Wof = Wo * s2.reshape(-1, 1)                     # (h2, 1)
    bof = bo + sh2 @ Wo                              # (1, 1)

    h1_p = _round_up(h1, 128)
    h2_p = _round_up(h2, 128)
    num_p = _round_up(numerical_dim, 8)

    def pad2(a, r, c):
        return jnp.pad(a, ((0, r - a.shape[0]), (0, c - a.shape[1])))

    return {
        # everything transposed: batch lives on the lane axis inside the kernel
        "P":   pad2(P.T,   h1_p, total_pad).astype(mm_dtype),
        "W1n": pad2(W1n.T, h1_p, num_p).astype(mm_dtype),
        "sn":  pad2(sn.T,  num_p, 1).astype(jnp.float32),
        "shn": pad2(shn.T, num_p, 1).astype(jnp.float32),
        "b1":  pad2(b1.T,  h1_p, 1).astype(jnp.float32),
        "W2":  pad2(W2f.T, h2_p, h1_p).astype(mm_dtype),
        "b2":  pad2(b2f.T, h2_p, 1).astype(jnp.float32),
        "wo":  pad2(Wof,   h2_p, 1).astype(jnp.float32),
        "bo":  bof.astype(jnp.float32),
        "offsets": tuple(int(o) for o in offsets),
        "num_pad": num_p,
    }


# --------------------------------------------------------------------------- #
# Forward pass (only id/numerical transpose+pad in JAX; everything else fused)
# --------------------------------------------------------------------------- #
def forward(params, kparams, x_categorical, x_numerical, *, tb=2048):
    del params  # raw parameters are fully baked into kparams
    B = x_categorical.shape[0]
    num_dim = x_numerical.shape[1]
    num_p = kparams["num_pad"]

    # Big batch tiles amortize the ~0.35us/grid-step overhead; keep tb a
    # multiple of 128 so the batch-on-lanes blocks stay lane-aligned.
    # TODO(synk): on v7x pick tb so b_pad // tb >= 2 to keep both TCs busy.
    tb_eff = min(_round_up(tb, 128), _round_up(B, 128))
    b_pad = _round_up(B, tb_eff)

    ids_t = jnp.pad(x_categorical.astype(jnp.int32).T, ((0, 0), (0, b_pad - B)))
    xnum_t = jnp.pad(x_numerical.astype(jnp.float32).T,
                     ((0, num_p - num_dim), (0, b_pad - B)))

    out = mlp_pallas(ids_t, xnum_t, kparams, tb=tb_eff)      # (1, b_pad)
    return out.reshape(-1, 1)[:B]


# Pure-JAX reference (f32, unfolded) for correctness check.
def reference_forward(params, x_categorical, x_numerical):
    cust = jnp.take(params["cust_emb"], x_categorical[:, 0], axis=0)
    prod = jnp.take(params["prod_emb"], x_categorical[:, 1], axis=0)
    cats = [jnp.take(w, x_categorical[:, i + 2], axis=0)
            for i, w in enumerate(params["cat_embs"])]
    x_emb = jnp.concatenate([cust, prod] + cats, axis=1)
    x2 = x_numerical * params["bn_num_scale"] + params["bn_num_shift"]
    x = jnp.concatenate([x_emb, x2], axis=1)
    for i in range(len(params["W"])):
        x = jnp.maximum(x @ params["W"][i] + params["b"][i], 0.0)
        x = x * params["bn_scale"][i] + params["bn_shift"][i]
    return jax.nn.sigmoid(x @ params["Wo"] + params["bo"])


if __name__ == "__main__":
    key = jax.random.PRNGKey(0)
    k_param, k_cat, k_num = jax.random.split(key, 3)

    # small shapes consistent with the module's forward
    B = 8
    n_customers, n_products = 10, 12
    keys_embedding_dim = 16
    categorical_embedding_dim = [(5, 4), (7, 4)]   # two extra categorical features
    numerical_dim = 4
    hidden_dim = [32, 16]

    params = init_params(k_param, n_customers, n_products, keys_embedding_dim,
                         categorical_embedding_dim, numerical_dim, hidden_dim)
    kparams = prepare_kernel_params(params, numerical_dim)

    # x_categorical: [B, 2 + n_cat_feats] int32; x_numerical: [B, numerical_dim] f32
    cust_ids = jax.random.randint(k_cat, (B, 1), 0, n_customers)
    prod_ids = jax.random.randint(jax.random.fold_in(k_cat, 1), (B, 1), 0, n_products)
    cat_cols = [jax.random.randint(jax.random.fold_in(k_cat, 2 + i), (B, 1), 0, n)
                for i, (n, _) in enumerate(categorical_embedding_dim)]
    x_categorical = jnp.concatenate([cust_ids, prod_ids] + cat_cols,
                                    axis=1).astype(jnp.int32)
    x_numerical = jax.random.normal(k_num, (B, numerical_dim), jnp.float32)

    out = forward(params, kparams, x_categorical, x_numerical)
    out = jax.block_until_ready(out)

    assert out.shape == (B, 1)
    assert bool(jnp.all((out >= 0.0) & (out <= 1.0)))
    ref = reference_forward(params, x_categorical, x_numerical)
    assert bool(jnp.max(jnp.abs(out - ref)) < 2e-2)   # bf16 matmul tolerance
    print("KERNEL_OK")
</pallas_src>

<mosaic_0001>
module attributes {stable_mosaic.version = 11 : i64} {
  func.func @mlp_kernel(%arg0: i32, %arg1: memref<4x128xi32, #tpu.memory_space<vmem>>, %arg2: memref<8x128xf32, #tpu.memory_space<vmem>>, %arg3: memref<128x128xbf16, #tpu.memory_space<vmem>>, %arg4: memref<128x8xbf16, #tpu.memory_space<vmem>>, %arg5: memref<8x1xf32, #tpu.memory_space<vmem>>, %arg6: memref<8x1xf32, #tpu.memory_space<vmem>>, %arg7: memref<128x1xf32, #tpu.memory_space<vmem>>, %arg8: memref<128x128xbf16, #tpu.memory_space<vmem>>, %arg9: memref<128x1xf32, #tpu.memory_space<vmem>>, %arg10: memref<128x1xf32, #tpu.memory_space<vmem>>, %arg11: memref<1x1xf32, #tpu.memory_space<vmem>>, %arg12: memref<1x128xf32, #tpu.memory_space<vmem>>) attributes {dimension_semantics = [#tpu.dimension_semantics<parallel>], iteration_bounds = array<i64: 1>, scalar_prefetch = 0 : i64, scratch_operands = 0 : i64, tpu.core_type = #tpu.core_type<tc>, window_params = [{transform_indices = @transform_0, window_bounds = array<i64: 4, 128>}, {transform_indices = @transform_1, window_bounds = array<i64: 8, 128>}, {pipeline_mode = #tpu.pipeline_mode<synchronous>, transform_indices = @transform_2, window_bounds = array<i64: 128, 128>}, {pipeline_mode = #tpu.pipeline_mode<synchronous>, transform_indices = @transform_3, window_bounds = array<i64: 128, 8>}, {pipeline_mode = #tpu.pipeline_mode<synchronous>, transform_indices = @transform_4, window_bounds = array<i64: 8, 1>}, {pipeline_mode = #tpu.pipeline_mode<synchronous>, transform_indices = @transform_5, window_bounds = array<i64: 8, 1>}, {pipeline_mode = #tpu.pipeline_mode<synchronous>, transform_indices = @transform_6, window_bounds = array<i64: 128, 1>}, {pipeline_mode = #tpu.pipeline_mode<synchronous>, transform_indices = @transform_7, window_bounds = array<i64: 128, 128>}, {pipeline_mode = #tpu.pipeline_mode<synchronous>, transform_indices = @transform_8, window_bounds = array<i64: 128, 1>}, {pipeline_mode = #tpu.pipeline_mode<synchronous>, transform_indices = @transform_9, window_bounds = array<i64: 128, 1>}, {pipeline_mode = #tpu.pipeline_mode<synchronous>, transform_indices = @transform_10, window_bounds = array<i64: 1, 1>}, {transform_indices = @transform_11, window_bounds = array<i64: 1, 128>}]} {
    %c0 = arith.constant 0 : index
    %c0_0 = arith.constant 0 : index
    %0 = vector.load %arg1[%c0, %c0_0] : memref<4x128xi32, #tpu.memory_space<vmem>>, vector<4x128xi32>
    %1 = tpu.iota {dimensions = array<i32: 0>} : vector<128x128xi32>
    %2 = vector.extract_strided_slice %0 {offsets = [0, 0], sizes = [1, 128], strides = [1, 1]} : vector<4x128xi32> to vector<1x128xi32>
    %c0_i32 = arith.constant 0 : i32
    %3 = vector.broadcast %c0_i32 : i32 to vector<1x128xi32>
    %4 = arith.addi %2, %3 : vector<1x128xi32>
    %5 = vector.broadcast %4 : vector<1x128xi32> to vector<128x128xi32>
    %6 = arith.cmpi eq, %1, %5 : vector<128x128xi32>
    %7 = vector.extract_strided_slice %0 {offsets = [1, 0], sizes = [1, 128], strides = [1, 1]} : vector<4x128xi32> to vector<1x128xi32>
    %c10_i32 = arith.constant 10 : i32
    %8 = vector.broadcast %c10_i32 : i32 to vector<1x128xi32>
    %9 = arith.addi %7, %8 : vector<1x128xi32>
    %10 = vector.broadcast %9 : vector<1x128xi32> to vector<128x128xi32>
    %11 = arith.cmpi eq, %1, %10 : vector<128x128xi32>
    %12 = arith.ori %6, %11 : vector<128x128xi1>
    %13 = vector.extract_strided_slice %0 {offsets = [2, 0], sizes = [1, 128], strides = [1, 1]} : vector<4x128xi32> to vector<1x128xi32>
    %c22_i32 = arith.constant 22 : i32
    %14 = vector.broadcast %c22_i32 : i32 to vector<1x128xi32>
    %15 = arith.addi %13, %14 : vector<1x128xi32>
    %16 = vector.broadcast %15 : vector<1x128xi32> to vector<128x128xi32>
    %17 = arith.cmpi eq, %1, %16 : vector<128x128xi32>
    %18 = arith.ori %12, %17 : vector<128x128xi1>
    %19 = vector.extract_strided_slice %0 {offsets = [3, 0], sizes = [1, 128], strides = [1, 1]} : vector<4x128xi32> to vector<1x128xi32>
    %c27_i32 = arith.constant 27 : i32
    %20 = vector.broadcast %c27_i32 : i32 to vector<1x128xi32>
    %21 = arith.addi %19, %20 : vector<1x128xi32>
    %22 = vector.broadcast %21 : vector<1x128xi32> to vector<128x128xi32>
    %23 = arith.cmpi eq, %1, %22 : vector<128x128xi32>
    %24 = arith.ori %18, %23 : vector<128x128xi1>
    %25 = arith.extui %24 : vector<128x128xi1> to vector<128x128xi32>
    %26 = arith.sitofp %25 : vector<128x128xi32> to vector<128x128xf32>
    %27 = arith.truncf %26 : vector<128x128xf32> to vector<128x128xbf16>
    %c0_1 = arith.constant 0 : index
    %c0_2 = arith.constant 0 : index
    %28 = vector.load %arg3[%c0_1, %c0_2] : memref<128x128xbf16, #tpu.memory_space<vmem>>, vector<128x128xbf16>
    %cst = arith.constant dense<0.000000e+00> : vector<128x128xf32>
    %29 = tpu.matmul %28, %27, %cst {dimension_numbers = #tpu.dot_dimension_numbers<[1], [0], [0], [1], [0, 0, 1, 1], [], []>} : vector<128x128xbf16>, vector<128x128xbf16>, vector<128x128xf32> -> vector<128x128xf32>
    %c0_3 = arith.constant 0 : index
    %c0_4 = arith.constant 0 : index
    %30 = vector.load %arg2[%c0_3, %c0_4] : memref<8x128xf32, #tpu.memory_space<vmem>>, vector<8x128xf32>
    %c0_5 = arith.constant 0 : index
    %c0_6 = arith.constant 0 : index
    %31 = vector.load %arg5[%c0_5, %c0_6] : memref<8x1xf32, #tpu.memory_space<vmem>>, vector<8x1xf32>
    %32 = vector.broadcast %31 : vector<8x1xf32> to vector<8x128xf32>
    %33 = arith.mulf %30, %32 : vector<8x128xf32>
    %c0_7 = arith.constant 0 : index
    %c0_8 = arith.constant 0 : index
    %34 = vector.load %arg6[%c0_7, %c0_8] : memref<8x1xf32, #tpu.memory_space<vmem>>, vector<8x1xf32>
    %35 = vector.broadcast %34 : vector<8x1xf32> to vector<8x128xf32>
    %36 = arith.addf %33, %35 : vector<8x128xf32>
    %c0_9 = arith.constant 0 : index
    %c0_10 = arith.constant 0 : index
    %37 = vector.load %arg4[%c0_9, %c0_10] : memref<128x8xbf16, #tpu.memory_space<vmem>>, vector<128x8xbf16>
    %38 = arith.truncf %36 : vector<8x128xf32> to vector<8x128xbf16>
    %cst_11 = arith.constant dense<0.000000e+00> : vector<128x128xf32>
    %39 = tpu.matmul %37, %38, %cst_11 {dimension_numbers = #tpu.dot_dimension_numbers<[1], [0], [0], [1], [0, 0, 1, 1], [], []>} : vector<128x8xbf16>, vector<8x128xbf16>, vector<128x128xf32> -> vector<128x128xf32>
    %40 = arith.addf %29, %39 : vector<128x128xf32>
    %c0_12 = arith.constant 0 : index
    %c0_13 = arith.constant 0 : index
    %41 = vector.load %arg7[%c0_12, %c0_13] : memref<128x1xf32, #tpu.memory_space<vmem>>, vector<128x1xf32>
    %42 = vector.broadcast %41 : vector<128x1xf32> to vector<128x128xf32>
    %43 = arith.addf %40, %42 : vector<128x128xf32>
    %cst_14 = arith.constant 0.000000e+00 : f32
    %44 = vector.broadcast %cst_14 : f32 to vector<128x128xf32>
    %45 = arith.maximumf %43, %44 : vector<128x128xf32>
    %c0_15 = arith.constant 0 : index
    %c0_16 = arith.constant 0 : index
    %46 = vector.load %arg8[%c0_15, %c0_16] : memref<128x128xbf16, #tpu.memory_space<vmem>>, vector<128x128xbf16>
    %47 = arith.truncf %45 : vector<128x128xf32> to vector<128x128xbf16>
    %cst_17 = arith.constant dense<0.000000e+00> : vector<128x128xf32>
    %48 = tpu.matmul %46, %47, %cst_17 {dimension_numbers = #tpu.dot_dimension_numbers<[1], [0], [0], [1], [0, 0, 1, 1], [], []>} : vector<128x128xbf16>, vector<128x128xbf16>, vector<128x128xf32> -> vector<128x128xf32>
    %c0_18 = arith.constant 0 : index
    %c0_19 = arith.constant 0 : index
    %49 = vector.load %arg9[%c0_18, %c0_19] : memref<128x1xf32, #tpu.memory_space<vmem>>, vector<128x1xf32>
    %50 = vector.broadcast %49 : vector<128x1xf32> to vector<128x128xf32>
    %51 = arith.addf %48, %50 : vector<128x128xf32>
    %cst_20 = arith.constant 0.000000e+00 : f32
    %52 = vector.broadcast %cst_20 : f32 to vector<128x128xf32>
    %53 = arith.maximumf %51, %52 : vector<128x128xf32>
    %c0_21 = arith.constant 0 : index
    %c0_22 = arith.constant 0 : index
    %54 = vector.load %arg10[%c0_21, %c0_22] : memref<128x1xf32, #tpu.memory_space<vmem>>, vector<128x1xf32>
    %55 = vector.broadcast %54 : vector<128x1xf32> to vector<128x128xf32>
    %56 = arith.mulf %53, %55 : vector<128x128xf32>
    %cst_23 = arith.constant dense<0.000000e+00> : vector<128xf32>
    %57 = vector.multi_reduction <add>, %56, %cst_23 [0] : vector<128x128xf32> to vector<128xf32>
    %58 = vector.shape_cast %57 : vector<128xf32> to vector<1x128xf32>
    %c0_24 = arith.constant 0 : index
    %c0_25 = arith.constant 0 : index
    %59 = vector.load %arg11[%c0_24, %c0_25] : memref<1x1xf32, #tpu.memory_space<vmem>>, vector<1x1xf32>
    %60 = vector.broadcast %59 : vector<1x1xf32> to vector<1x128xf32>
    %61 = arith.addf %58, %60 : vector<1x128xf32>
    %62 = arith.negf %61 : vector<1x128xf32>
    %63 = math.exp %62 : vector<1x128xf32>
    %cst_26 = arith.constant 1.000000e+00 : f32
    %64 = vector.broadcast %cst_26 : f32 to vector<1x128xf32>
    %65 = arith.addf %64, %63 : vector<1x128xf32>
    %66 = arith.divf %64, %65 : vector<1x128xf32>
    %c0_27 = arith.constant 0 : index
    %c0_28 = arith.constant 0 : index
    %67 = vector.load %arg12[%c0_27, %c0_28] : memref<1x128xf32, #tpu.memory_space<vmem>>, vector<1x128xf32>
    tpu.vector_store %arg12[%c0_27, %c0_28], %66 {strides = array<i32>} : memref<1x128xf32, #tpu.memory_space<vmem>>, vector<1x128xf32>,
    return
  }
  func.func @transform_0(%arg0: i32) -> (i32, i32) {
    %c0_i32 = arith.constant 0 : i32
    %c0_i32_0 = arith.constant 0 : i32
    return %c0_i32, %arg0 : i32, i32
  }
  func.func @transform_1(%arg0: i32) -> (i32, i32) {
    %c0_i32 = arith.constant 0 : i32
    %c0_i32_0 = arith.constant 0 : i32
    return %c0_i32, %arg0 : i32, i32
  }
  func.func @transform_2(%arg0: i32) -> (i32, i32) {
    %c0_i32 = arith.constant 0 : i32
    %c0_i32_0 = arith.constant 0 : i32
    %c0_i32_1 = arith.constant 0 : i32
    return %c0_i32, %c0_i32_0 : i32, i32
  }
  func.func @transform_3(%arg0: i32) -> (i32, i32) {
    %c0_i32 = arith.constant 0 : i32
    %c0_i32_0 = arith.constant 0 : i32
    %c0_i32_1 = arith.constant 0 : i32
    return %c0_i32, %c0_i32_0 : i32, i32
  }
  func.func @transform_4(%arg0: i32) -> (i32, i32) {
    %c0_i32 = arith.constant 0 : i32
    %c0_i32_0 = arith.constant 0 : i32
    %c0_i32_1 = arith.constant 0 : i32
    return %c0_i32, %c0_i32_0 : i32, i32
  }
  func.func @transform_5(%arg0: i32) -> (i32, i32) {
    %c0_i32 = arith.constant 0 : i32
    %c0_i32_0 = arith.constant 0 : i32
    %c0_i32_1 = arith.constant 0 : i32
    return %c0_i32, %c0_i32_0 : i32, i32
  }
  func.func @transform_6(%arg0: i32) -> (i32, i32) {
    %c0_i32 = arith.constant 0 : i32
    %c0_i32_0 = arith.constant 0 : i32
    %c0_i32_1 = arith.constant 0 : i32
    return %c0_i32, %c0_i32_0 : i32, i32
  }
  func.func @transform_7(%arg0: i32) -> (i32, i32) {
    %c0_i32 = arith.constant 0 : i32
    %c0_i32_0 = arith.constant 0 : i32
    %c0_i32_1 = arith.constant 0 : i32
    return %c0_i32, %c0_i32_0 : i32, i32
  }
  func.func @transform_8(%arg0: i32) -> (i32, i32) {
    %c0_i32 = arith.constant 0 : i32
    %c0_i32_0 = arith.constant 0 : i32
    %c0_i32_1 = arith.constant 0 : i32
    return %c0_i32, %c0_i32_0 : i32, i32
  }
  func.func @transform_9(%arg0: i32) -> (i32, i32) {
    %c0_i32 = arith.constant 0 : i32
    %c0_i32_0 = arith.constant 0 : i32
    %c0_i32_1 = arith.constant 0 : i32
    return %c0_i32, %c0_i32_0 : i32, i32
  }
  func.func @transform_10(%arg0: i32) -> (i32, i32) {
    %c0_i32 = arith.constant 0 : i32
    %c0_i32_0 = arith.constant 0 : i32
    %c0_i32_1 = arith.constant 0 : i32
    return %c0_i32, %c0_i32_0 : i32, i32
  }
  func.func @transform_11(%arg0: i32) -> (i32, i32) {
    %c0_i32 = arith.constant 0 : i32
    %c0_i32_0 = arith.constant 0 : i32
    return %c0_i32, %arg0 : i32, i32
  }
}

</mosaic_0001>

<bundles_post_ra>
// kernel: tpu_custom_call.1
= control target key start
LH: loop header
LB: loop body
LE: loop exit
PB: predicated region body
PF: predicated region fallthrough
CT: control target
= control target key end

     0   :  { %s1905_s0 = inlined_call_operand.vmem [shape: s32[4,128], index: 0, kind: input, shape index: {}]   ;;  %s1906_s1 = inlined_call_operand.vmem [shape: f32[8,128], index: 1, kind: input, shape index: {}]   ;;  %s1907_s2 = inlined_call_operand.vmem [shape: bf16[128,128], index: 2, kind: input, shape index: {}]   ;;  %s1908_s3 = inlined_call_operand.vmem [shape: bf16[128,8], index: 3, kind: input, shape index: {}]   ;;  %s1909_s4 = inlined_call_operand.vmem [shape: f32[8,1], index: 4, kind: input, shape index: {}]   ;;  %s1910_s5 = inlined_call_operand.vmem [shape: f32[8,1], index: 5, kind: input, shape index: {}]   ;;  %s1911_s6 = inlined_call_operand.vmem [shape: f32[128,1], index: 6, kind: input, shape index: {}]   ;;  %s1912_s7 = inlined_call_operand.vmem [shape: bf16[128,128], index: 7, kind: input, shape index: {}]   ;;  %s1913_s8 = inlined_call_operand.vmem [shape: f32[128,1], index: 8, kind: input, shape index: {}]   ;;  %s1914_s9 = inlined_call_operand.vmem [shape: f32[128,1], index: 9, kind: input, shape index: {}]   ;;  %s1915_s10 = inlined_call_operand.<no memory space> [shape: f32[1,1], index: 10, kind: input, shape index: {}]   ;;  %s1916_s11 = inlined_call_operand.hbm [shape: f32[1,128], index: 11, kind: output, shape index: {}]  }
   0x1   :  { %v16_v0 = vstv %s1915_s10 }
   0x2   :  { %17 = vst [vmem:[#allocation2] sm:$0x1] %v16_v0 }
   0x3   :  { %v248_v1 = vld [vmem:[%s1909_s4] sm:$0xff]  ;;  %v43_v2 = vlaneseq  ;;  %v1408_v3 = vmov 0   ;;  %v600_v18 = vld [vmem:[%s1911_s6 + $0x50] sm:$0xff]  ;;  %v605_v29 = vld [vmem:[%s1911_s6 + $0x78] sm:$0xff]  ;;  %v1409_v31 = vmov 1.0|1.0  }
   0x4   :  { %1356 = vset.pattern.permute.xlu0 %v1408_v3  ;;  %1357 = vset.pattern.permute.xlu1 %v1408_v3  ;;  %v255_v5 = vld [vmem:[%s1910_s5] sm:$0xff]  ;;  %v604_v23 = vld [vmem:[%s1911_s6 + $0x70] sm:$0xff]  ;;  %v603_v30 = vld [vmem:[%s1911_s6 + $0x68] sm:$0xff] }
   0x5   :  { %251 = vperm.xlu0 %1356, %v248_v1   ;;  %v1477_v4 = vshrl.u32 %v43_v2, 7  ;;  %v602_v7 = vld [vmem:[%s1911_s6 + $0x60] sm:$0xff]  ;;  %678 = vperm.xlu1 %1357, %v604_v23   ;;  %v596_v27 = vld [vmem:[%s1911_s6 + $0x30] sm:$0xff]  ;;  %v601_v37 = vld [vmem:[%s1911_s6 + $0x58] sm:$0xff] }
   0x6   :  { %v42_v11 = vld [vmem:[%s1905_s0] sm:$0xf]  ;;  %v592_v38 = vld [vmem:[%s1911_s6 + $0x10] sm:$0xff]  ;;  %v599_v40 = vld [vmem:[%s1911_s6 + $0x48] sm:$0xff] }
   0x7   :  { %v62_v6 = vsub.s32 0, %v1477_v4  ;;  %v58_v8 = vadd.s32 112, %v1477_v4  ;;  %v83_v9 = vsub.s32 1, %v1477_v4  ;;  %v120_v10 = vsub.s32 2, %v1477_v4  ;;  %v1358_v21 = vld [vmem:[%s1907_s2] sm:$0xff]   ;;  %v597_v44 = vld [vmem:[%s1911_s6 + $0x38] sm:$0xff] }
   0x8   :  { %v59_v12 = vadd.s32 120, %v1477_v4  ;;  %v157_v13 = vsub.s32 3, %v1477_v4  ;;  %v80_v15 = vadd.s32 10, %v42_v11  ;;  %v117_v16 = vadd.s32 22, %v42_v11  ;;  %1304 = vmatprep.mubr.bf16.mxu1 %v1358_v21  ;;  %v598_v24 = vld [vmem:[%s1911_s6 + $0x40] sm:$0xff]  ;;  %v595_v48 = vld [vmem:[%s1911_s6 + $0x28] sm:$0xff] }
   0x9   :  { %258 = vperm.xlu0 %1356, %v255_v5   ;;  %v1496_v14 = vrot.slane %v42_v11, %v62_v6  ;;  %v154_v17 = vadd.s32 27, %v42_v11  ;;  %v56_v25 = vadd.s32 96, %v1477_v4  ;;  %v57_v26 = vadd.s32 104, %v1477_v4  ;;  %683 = vperm.xlu1 %1357, %v605_v29   ;;  %v594_v34 = vld [vmem:[%s1911_s6 + $0x20] sm:$0xff]  ;;  %v744_v49 = vld [vmem:[%s1913_s8 + $0x10] sm:$0xff]  ;;  %v593_v50 = vld [vmem:[%s1911_s6 + $0x18] sm:$0xff] }
   0xa   :  { %v1502_v19 = vrot.slane %v80_v15, %v83_v9  ;;  %v1504_v20 = vrot.slane %v117_v16, %v120_v10  ;;  %v54_v32 = vadd.s32 80, %v1477_v4  ;;  %v55_v33 = vadd.s32 88, %v1477_v4  ;;  %v1360_v36 = vld [vmem:[%s1908_s3] sm:$0xff]   ;;  %v591_v54 = vld [vmem:[%s1911_s6 + $0x8] sm:$0xff]  ;;  %v745_v62 = vld [vmem:[%s1913_s8 + $0x18] sm:$0xff] }
   0xb   :  { %vm78_vm0 = vcmp.eq.s32.totalorder %v58_v8, %v1496_v14  ;;  %vm79_vm1 = vcmp.eq.s32.totalorder %v59_v12, %v1496_v14  ;;  %v1510_v22 = vrot.slane %v154_v17, %v157_v13  ;;  %vm76_vm13 = vcmp.eq.s32.totalorder %v56_v25, %v1496_v14  ;;  %v590_v42 = vld [vmem:[%s1911_s6] sm:$0xff]  ;;  %v743_v58 = vld [vmem:[%s1913_s8 + $0x8] sm:$0xff]  ;;  %v748_v0 = vld [vmem:[%s1913_s8 + $0x30] sm:$0xff] }
   0xc   :  { %vm99_vm2 = vcmp.eq.s32.totalorder %v58_v8, %v1502_v19  ;;  %vm100_vm3 = vcmp.eq.s32.totalorder %v59_v12, %v1502_v19  ;;  %vm136_vm4 = vcmp.eq.s32.totalorder %v58_v8, %v1504_v20  ;;  %vm137_vm6 = vcmp.eq.s32.totalorder %v59_v12, %v1504_v20  ;;  %v742_v45 = vld [vmem:[%s1913_s8] sm:$0xff]  ;;  %v747_v61 = vld [vmem:[%s1913_s8 + $0x28] sm:$0xff]  ;;  %v749_v3 = vld [vmem:[%s1913_s8 + $0x38] sm:$0xff] }
   0xd   :  { %668 = vperm.xlu0 %1356, %v602_v7   ;;  %vm115_vm5 = vmor %vm78_vm0, %vm99_vm2  ;;  %vm173_vm8 = vcmp.eq.s32.totalorder %v58_v8, %v1510_v22  ;;  %vm174_vm10 = vcmp.eq.s32.totalorder %v59_v12, %v1510_v22  ;;  %vm97_vm14 = vcmp.eq.s32.totalorder %v56_v25, %v1502_v19  ;;  %vm77_vm0 = vcmp.eq.s32.totalorder %v57_v26, %v1496_v14  ;;  %v999_v52 = vld [vmem:[%s1914_s9] sm:$0xff]  ;;  %v1000_v1 = vld [vmem:[%s1914_s9 + $0x8] sm:$0xff] }
   0xe   :  { %vm116_vm7 = vmor %vm79_vm1, %vm100_vm3  ;;  %vm98_vm1 = vcmp.eq.s32.totalorder %v57_v26, %v1502_v19  ;;  %vm134_vm3 = vcmp.eq.s32.totalorder %v56_v25, %v1504_v20  ;;  %673 = vperm.xlu1 %1357, %v603_v30   ;;  %v52_v39 = vadd.s32 64, %v1477_v4  ;;  %v53_v41 = vadd.s32 72, %v1477_v4  ;;  %v746_v57 = vld [vmem:[%s1913_s8 + $0x20] sm:$0xff]  ;;  %v1001_v7 = vld [vmem:[%s1914_s9 + $0x10] sm:$0xff] }
   0xf   :  { %vm152_vm9 = vmor %vm115_vm5, %vm136_vm4  ;;  %vm135_vm5 = vcmp.eq.s32.totalorder %v57_v26, %v1504_v20  ;;  %v50_v46 = vadd.s32 48, %v1477_v4  ;;  %v51_v47 = vadd.s32 56, %v1477_v4  ;;  %v48_v53 = vadd.s32 32, %v1477_v4  ;;  %v750_v8 = vld [vmem:[%s1913_s8 + $0x40] sm:$0xff]  ;;  %v1002_v9 = vld [vmem:[%s1914_s9 + $0x18] sm:$0xff] }
  0x10   :  { %vm153_vm11 = vmor %vm116_vm7, %vm137_vm6  ;;  %vm171_vm7 = vcmp.eq.s32.totalorder %v56_v25, %v1510_v22  ;;  %v49_v55 = vadd.s32 40, %v1477_v4  ;;  %v46_v59 = vadd.s32 16, %v1477_v4  ;;  %v47_v60 = vadd.s32 24, %v1477_v4  ;;  %v751_v10 = vld [vmem:[%s1913_s8 + $0x48] sm:$0xff]  ;;  %v1003_v11 = vld [vmem:[%s1914_s9 + $0x20] sm:$0xff] }
  0x11   :  { %658 = vperm.xlu0 %1356, %v600_v18   ;;  %vm1529_vm12 = vmor %vm152_vm9, %vm173_vm8  ;;  %vm172_vm9 = vcmp.eq.s32.totalorder %v57_v26, %v1510_v22  ;;  %v45_v2 = vadd.s32 8, %v1477_v4  ;;  %v1359_v12 = vld [vmem:[%s1907_s2 + $0x8] sm:$0xff]  }
  0x12   :  { %vm190_vm15 = vmor %vm153_vm11, %vm174_vm10  ;;  %663 = vperm.xlu1 %1357, %v601_v37  }
  0x13   :  { %vm1204_vm2 = vmpackc.low %vm190_vm15, %vm1529_vm12  ;;  %vm74_vm12 = vcmp.eq.s32.totalorder %v54_v32, %v1496_v14  ;;  %vm75_vm15 = vcmp.eq.s32.totalorder %v55_v33, %v1496_v14 }
  0x14   :  { %1288 = vmatprep.subr.msk.bf16.mxu1 %vm1204_vm2, %v1409_v31  ;;  %vm113_vm4 = vmor %vm76_vm13, %vm97_vm14  ;;  %vm95_vm13 = vcmp.eq.s32.totalorder %v54_v32, %v1502_v19 }
  0x15   :  { %648 = vperm.xlu0 %1356, %v598_v24   ;;  %1289 = vmatpush3.bf16.msk.msra.mxu1 %vm1204_vm2, %v1409_v31  ;;  %vm114_vm6 = vmor %vm77_vm0, %vm98_vm1  ;;  %vm96_vm0 = vcmp.eq.s32.totalorder %v55_v33, %v1502_v19  ;;  %vm132_vm2 = vcmp.eq.s32.totalorder %v54_v32, %v1504_v20 }
  0x16   :  { %vm150_vm8 = vmor %vm113_vm4, %vm134_vm3  ;;  %vm319_vm3 = vcmask 64512   ;;  %653 = vperm.xlu1 %1357, %v599_v40  }
  0x17   :  { %vm151_vm10 = vmor %vm114_vm6, %vm135_vm5  ;;  %vm133_vm5 = vcmp.eq.s32.totalorder %v55_v33, %v1504_v20  ;;  %1272 = vmatprep.mubr.msk.bf16.mxu0 %vm319_vm3, %v1360_v36 }
  0x18   :  { %vm1556_vm11 = vmor %vm150_vm8, %vm171_vm7  ;;  %vm169_vm7 = vcmp.eq.s32.totalorder %v54_v32, %v1510_v22 }
  0x19   :  { %638 = vperm.xlu0 %1356, %v596_v27   ;;  %vm188_vm14 = vmor %vm151_vm10, %vm172_vm9  ;;  %vm170_vm9 = vcmp.eq.s32.totalorder %v55_v33, %v1510_v22 }
  0x1a   :  { %vm1206_vm1 = vmpackc.low %vm188_vm14, %vm1556_vm11  ;;  %643 = vperm.xlu1 %1357, %v597_v44  }
  0x1b   :  { %1290 = vmatprep.subr.msk.bf16.mxu1 %vm1206_vm1, %v1409_v31  ;;  %vm111_vm4 = vmor %vm74_vm12, %vm95_vm13  ;;  %vm72_vm12 = vcmp.eq.s32.totalorder %v52_v39, %v1496_v14  ;;  %vm93_vm13 = vcmp.eq.s32.totalorder %v52_v39, %v1502_v19 }
  0x1c   :  { %1291 = vmatpush3.bf16.msk.msra.mxu1 %vm1206_vm1, %v1409_v31  ;;  %vm112_vm6 = vmor %vm75_vm15, %vm96_vm0  ;;  %vm73_vm15 = vcmp.eq.s32.totalorder %v53_v41, %v1496_v14  ;;  %vm94_vm0 = vcmp.eq.s32.totalorder %v53_v41, %v1502_v19 }
  0x1d   :  { %628 = vperm.xlu0 %1356, %v594_v34   ;;  %vm148_vm8 = vmor %vm111_vm4, %vm132_vm2  ;;  %vm130_vm2 = vcmp.eq.s32.totalorder %v52_v39, %v1504_v20 }
  0x1e   :  { %vm149_vm10 = vmor %vm112_vm6, %vm133_vm5  ;;  %vm131_vm5 = vcmp.eq.s32.totalorder %v53_v41, %v1504_v20  ;;  %633 = vperm.xlu1 %1357, %v595_v48  }
  0x1f   :  { %vm1590_vm11 = vmor %vm148_vm8, %vm169_vm7  ;;  %vm167_vm7 = vcmp.eq.s32.totalorder %v52_v39, %v1510_v22 }
  0x20   :  { %vm186_vm14 = vmor %vm149_vm10, %vm170_vm9  ;;  %vm168_vm9 = vcmp.eq.s32.totalorder %v53_v41, %v1510_v22 }
  0x21   :  { %618 = vperm.xlu0 %1356, %v592_v38   ;;  %vm1208_vm1 = vmpackc.low %vm186_vm14, %vm1590_vm11 }
  0x22   :  { %1292 = vmatprep.subr.msk.bf16.mxu1 %vm1208_vm1, %v1409_v31  ;;  %vm109_vm4 = vmor %vm72_vm12, %vm93_vm13  ;;  %vm70_vm12 = vcmp.eq.s32.totalorder %v50_v46, %v1496_v14  ;;  %vm91_vm13 = vcmp.eq.s32.totalorder %v50_v46, %v1502_v19  ;;  %623 = vperm.xlu1 %1357, %v593_v50  }
  0x23   :  { %1293 = vmatpush3.bf16.msk.msra.mxu1 %vm1208_vm1, %v1409_v31  ;;  %vm110_vm6 = vmor %vm73_vm15, %vm94_vm0  ;;  %vm71_vm15 = vcmp.eq.s32.totalorder %v51_v47, %v1496_v14  ;;  %vm92_vm0 = vcmp.eq.s32.totalorder %v51_v47, %v1502_v19 }
  0x24   :  { %vm146_vm8 = vmor %vm109_vm4, %vm130_vm2  ;;  %vm128_vm2 = vcmp.eq.s32.totalorder %v50_v46, %v1504_v20 }
  0x25   :  { %608 = vperm.xlu0 %1356, %v590_v42   ;;  %vm147_vm10 = vmor %vm110_vm6, %vm131_vm5  ;;  %vm129_vm5 = vcmp.eq.s32.totalorder %v51_v47, %v1504_v20 }
  0x26   :  { %vm1623_vm11 = vmor %vm146_vm8, %vm167_vm7  ;;  %vm165_vm7 = vcmp.eq.s32.totalorder %v50_v46, %v1510_v22  ;;  %613 = vperm.xlu1 %1357, %v591_v54  }
  0x27   :  { %vm184_vm14 = vmor %vm147_vm10, %vm168_vm9  ;;  %vm166_vm9 = vcmp.eq.s32.totalorder %v51_v47, %v1510_v22 }
  0x28   :  { %vm1210_vm1 = vmpackc.low %vm184_vm14, %vm1623_vm11 }
  0x29   :  { %760 = vperm.xlu0 %1356, %v742_v45   ;;  %1294 = vmatprep.subr.msk.bf16.mxu1 %vm1210_vm1, %v1409_v31  ;;  %vm107_vm4 = vmor %vm70_vm12, %vm91_vm13  ;;  %vm68_vm12 = vcmp.eq.s32.totalorder %v48_v53, %v1496_v14  ;;  %vm89_vm13 = vcmp.eq.s32.totalorder %v48_v53, %v1502_v19 }
  0x2a   :  { %1295 = vmatpush3.bf16.msk.msra.mxu1 %vm1210_vm1, %v1409_v31  ;;  %vm108_vm6 = vmor %vm71_vm15, %vm92_vm0  ;;  %vm69_vm15 = vcmp.eq.s32.totalorder %v49_v55, %v1496_v14  ;;  %vm90_vm0 = vcmp.eq.s32.totalorder %v49_v55, %v1502_v19  ;;  %765 = vperm.xlu1 %1357, %v743_v58  }
  0x2b   :  { %vm144_vm8 = vmor %vm107_vm4, %vm128_vm2  ;;  %vm126_vm2 = vcmp.eq.s32.totalorder %v48_v53, %v1504_v20 }
  0x2c   :  { %vm145_vm10 = vmor %vm108_vm6, %vm129_vm5  ;;  %vm127_vm5 = vcmp.eq.s32.totalorder %v49_v55, %v1504_v20 }
  0x2d   :  { %770 = vperm.xlu0 %1356, %v744_v49   ;;  %vm1647_vm11 = vmor %vm144_vm8, %vm165_vm7  ;;  %vm163_vm7 = vcmp.eq.s32.totalorder %v48_v53, %v1510_v22 }
  0x2e   :  { %vm182_vm14 = vmor %vm145_vm10, %vm166_vm9  ;;  %vm164_vm9 = vcmp.eq.s32.totalorder %v49_v55, %v1510_v22  ;;  %775 = vperm.xlu1 %1357, %v745_v62  }
  0x2f   :  { %vm1212_vm1 = vmpackc.low %vm182_vm14, %vm1647_vm11 }
  0x30   :  { %1296 = vmatprep.subr.msk.bf16.mxu1 %vm1212_vm1, %v1409_v31  ;;  %vm105_vm4 = vmor %vm68_vm12, %vm89_vm13  ;;  %vm66_vm12 = vcmp.eq.s32.totalorder %v46_v59, %v1496_v14  ;;  %vm87_vm13 = vcmp.eq.s32.totalorder %v46_v59, %v1502_v19 }
  0x31   :  { %1017 = vperm.xlu0 %1356, %v999_v52   ;;  %1297 = vmatpush3.bf16.msk.msra.mxu1 %vm1212_vm1, %v1409_v31  ;;  %vm106_vm6 = vmor %vm69_vm15, %vm90_vm0  ;;  %vm67_vm15 = vcmp.eq.s32.totalorder %v47_v60, %v1496_v14  ;;  %vm88_vm0 = vcmp.eq.s32.totalorder %v47_v60, %v1502_v19 }
  0x32   :  { %vm142_vm8 = vmor %vm105_vm4, %vm126_vm2  ;;  %vm124_vm2 = vcmp.eq.s32.totalorder %v46_v59, %v1504_v20  ;;  %1022 = vperm.xlu1 %1357, %v1000_v1  }
  0x33   :  { %vm143_vm10 = vmor %vm106_vm6, %vm127_vm5  ;;  %vm125_vm5 = vcmp.eq.s32.totalorder %v47_v60, %v1504_v20 }
  0x34   :  { %vm1677_vm11 = vmor %vm142_vm8, %vm163_vm7  ;;  %vm161_vm7 = vcmp.eq.s32.totalorder %v46_v59, %v1510_v22 }
  0x35   :  { %780 = vperm.xlu0 %1356, %v746_v57   ;;  %vm180_vm14 = vmor %vm143_vm10, %vm164_vm9  ;;  %vm162_vm9 = vcmp.eq.s32.totalorder %v47_v60, %v1510_v22 }
  0x36   :  { %vm1214_vm1 = vmpackc.low %vm180_vm14, %vm1677_vm11  ;;  %1027 = vperm.xlu1 %1357, %v1001_v7  }
  0x37   :  { %1298 = vmatprep.subr.msk.bf16.mxu1 %vm1214_vm1, %v1409_v31  ;;  %vm103_vm4 = vmor %vm66_vm12, %vm87_vm13  ;;  %vm64_vm12 = vcmp.eq.s32.totalorder %v1477_v4, %v1496_v14  ;;  %vm85_vm13 = vcmp.eq.s32.totalorder %v1477_v4, %v1502_v19 }
  0x38   :  { %1299 = vmatpush3.bf16.msk.msra.mxu1 %vm1214_vm1, %v1409_v31  ;;  %vm104_vm6 = vmor %vm67_vm15, %vm88_vm0  ;;  %vm65_vm15 = vcmp.eq.s32.totalorder %v45_v2, %v1496_v14  ;;  %vm86_vm0 = vcmp.eq.s32.totalorder %v45_v2, %v1502_v19 }
  0x39   :  { %785 = vperm.xlu0 %1356, %v747_v61   ;;  %vm140_vm8 = vmor %vm103_vm4, %vm124_vm2  ;;  %vm122_vm2 = vcmp.eq.s32.totalorder %v1477_v4, %v1504_v20 }
  0x3a   :  { %vm141_vm10 = vmor %vm104_vm6, %vm125_vm5  ;;  %vm123_vm5 = vcmp.eq.s32.totalorder %v45_v2, %v1504_v20  ;;  %1032 = vperm.xlu1 %1357, %v1002_v9  }
  0x3b   :  { %vm1703_vm11 = vmor %vm140_vm8, %vm161_vm7  ;;  %vm159_vm7 = vcmp.eq.s32.totalorder %v1477_v4, %v1510_v22 }
  0x3c   :  { %vm178_vm14 = vmor %vm141_vm10, %vm162_vm9  ;;  %vm160_vm9 = vcmp.eq.s32.totalorder %v45_v2, %v1510_v22 }
  0x3d   :  { %790 = vperm.xlu0 %1356, %v748_v0   ;;  %vm1216_vm1 = vmpackc.low %vm178_vm14, %vm1703_vm11 }
  0x3e   :  { %1300 = vmatprep.subr.msk.bf16.mxu1 %vm1216_vm1, %v1409_v31  ;;  %vm101_vm4 = vmor %vm64_vm12, %vm85_vm13 }
  0x3f   :  { %1301 = vmatpush3.bf16.msk.msra.mxu1 %vm1216_vm1, %v1409_v31  ;;  %vm102_vm6 = vmor %vm65_vm15, %vm86_vm0 }
  0x40   :  { %vm138_vm8 = vmor %vm101_vm4, %vm122_vm2 }
  0x41   :  { %795 = vperm.xlu0 %1356, %v749_v3   ;;  %vm139_vm10 = vmor %vm102_vm6, %vm123_vm5 }
  0x42   :  { %vm175_vm11 = vmor %vm138_vm8, %vm159_vm7 }
  0x43   :  { %vm176_vm12 = vmor %vm139_vm10, %vm160_vm9 }
  0x44   :  { %vm1218_vm13 = vmpackc.low %vm176_vm12, %vm175_vm11 }
  0x45   :  { %800 = vperm.xlu0 %1356, %v750_v8   ;;  %1302 = vmatprep.subr.msk.bf16.mxu1 %vm1218_vm13, %v1409_v31 }
  0x49   :  { %805 = vperm.xlu0 %1356, %v751_v10  }
  0x4a   :  { %18 = vsyncpa [#allocation4], 0  ;;  %v752_v13 = vld [vmem:[%s1913_s8 + $0x50] sm:$0xff]  ;;  %1303 = vmatpush3.bf16.msk.msra.mxu1 %vm1218_vm13, %v1409_v31  ;;  %1037 = vperm.xlu1 %1357, %v1003_v11   ;;  %v1004_v15 = vld [vmem:[%s1914_s9 + $0x28] sm:$0xff]  ;;  %vm344_vm14 = vcmask 1043456  }
  0x4b   :  { %v1362_v14 = vld [vmem:[%s1907_s2 + $0x10] sm:$0xff]   ;;  %v753_v16 = vld [vmem:[%s1913_s8 + $0x58] sm:$0xff]  ;;  %v754_v19 = vld [vmem:[%s1913_s8 + $0x60] sm:$0xff] }
  0x4c   :  { %v1005_v17 = vld [vmem:[%s1914_s9 + $0x30] sm:$0xff]  ;;  %v1363_v18 = vld [vmem:[%s1907_s2 + $0x18] sm:$0xff]   ;;  %v1366_v20 = vld [vmem:[%s1907_s2 + $0x20] sm:$0xff]  }
  0x4d   :  { %810 = vperm.xlu0 %1356, %v752_v13   ;;  %1305 = vmatmul.mubr.bf16.vlgmr.msra.gmra.mxu1 %v1359_v12  ;;  %v1006_v21 = vld [vmem:[%s1914_s9 + $0x38] sm:$0xff]  ;;  %v755_v22 = vld [vmem:[%s1913_s8 + $0x68] sm:$0xff]  ;;  %v1007_v23 = vld [vmem:[%s1914_s9 + $0x40] sm:$0xff] }
  0x4e   :  { %1308 = vmatprep.mubr.bf16.mxu1 %v1362_v14  ;;  %1042 = vperm.xlu1 %1357, %v1004_v15   ;;  %v1367_v24 = vld [vmem:[%s1907_s2 + $0x28] sm:$0xff]   ;;  %v756_v25 = vld [vmem:[%s1913_s8 + $0x70] sm:$0xff]  ;;  %v757_v28 = vld [vmem:[%s1913_s8 + $0x78] sm:$0xff] }
  0x4f   :  { %v1370_v26 = vld [vmem:[%s1907_s2 + $0x30] sm:$0xff]   ;;  %v1008_v27 = vld [vmem:[%s1914_s9 + $0x48] sm:$0xff]  ;;  %v1371_v30 = vld [vmem:[%s1907_s2 + $0x38] sm:$0xff]  }
  0x50   :  { %v1009_v29 = vld [vmem:[%s1914_s9 + $0x50] sm:$0xff]  ;;  %v1010_v32 = vld [vmem:[%s1914_s9 + $0x58] sm:$0xff]  ;;  %v1132_v33 = vld [vmem:[#allocation2] sm:$0x1] }
  0x51   :  { %815 = vperm.xlu0 %1356, %v753_v16   ;;  %v1013_v31 = vld [vmem:[%s1914_s9 + $0x70] sm:$0xff]  ;;  %v1011_v34 = vld [vmem:[%s1914_s9 + $0x60] sm:$0xff]  ;;  %v1012_v35 = vld [vmem:[%s1914_s9 + $0x68] sm:$0xff] }
  0x52   :  { %1047 = vperm.xlu1 %1357, %v1005_v17   ;;  %v1014_v36 = vld [vmem:[%s1914_s9 + $0x78] sm:$0xff]  ;;  %v247_v38 = vld [vmem:[%s1906_s1] sm:$0xff]  ;;  %v1361_v44 = vld [vmem:[%s1908_s3 + $0x8] sm:$0xff]  }
  0x53   :  { %v1364_v45 = vld [vmem:[%s1908_s3 + $0x10] sm:$0xff]   ;;  %v1365_v46 = vld [vmem:[%s1908_s3 + $0x18] sm:$0xff]   ;;  %v1368_v47 = vld [vmem:[%s1908_s3 + $0x20] sm:$0xff]  }
  0x54   :  { %v1369_v48 = vld [vmem:[%s1908_s3 + $0x28] sm:$0xff]   ;;  %v1372_v49 = vld [vmem:[%s1908_s3 + $0x30] sm:$0xff]   ;;  %v1373_v50 = vld [vmem:[%s1908_s3 + $0x38] sm:$0xff]  }
  0x55   :  { %820 = vperm.xlu0 %1356, %v754_v19   ;;  %1309 = vmatmul.mubr.bf16.gmra.mxu1 %v1363_v18  ;;  %v1374_v51 = vld [vmem:[%s1912_s7] sm:$0xff]  }
  0x56   :  { %1312 = vmatprep.mubr.bf16.mxu1 %v1366_v20  ;;  %1052 = vperm.xlu1 %1357, %v1006_v21  }
  0x59   :  { %825 = vperm.xlu0 %1356, %v755_v22  }
  0x5a   :  { %1057 = vperm.xlu1 %1357, %v1007_v23  }
  0x5d   :  { %830 = vperm.xlu0 %1356, %v756_v25   ;;  %1313 = vmatmul.mubr.bf16.gmra.mxu1 %v1367_v24 }
  0x5e   :  { %1316 = vmatprep.mubr.bf16.mxu1 %v1370_v26  ;;  %1062 = vperm.xlu1 %1357, %v1008_v27  }
  0x61   :  { %835 = vperm.xlu0 %1356, %v757_v28  }
  0x62   :  { %1067 = vperm.xlu1 %1357, %v1009_v29  }
  0x65   :  { %1087 = vperm.xlu0 %1356, %v1013_v31   ;;  %1317 = vmatmul.mubr.bf16.gmra.mxu1 %v1371_v30 }
  0x66   :  { %1072 = vperm.xlu1 %1357, %v1010_v32  }
  0x69   :  { %1135 = vperm.xlu0 %1356, %v1132_v33  }
  0x6a   :  { %1077 = vperm.xlu1 %1357, %v1011_v34  }
  0x6e   :  { %1082 = vperm.xlu1 %1357, %v1012_v35  }
  0x72   :  { %1092 = vperm.xlu1 %1357, %v1014_v36  }
  0x80   :  { %v252_v37 = vpop.permute.xlu0 %251  ;;  %v679_v63 = vpop.permute.xlu1 %678 }
  0x81   :  { %v254_v39 = vmul.f32 %v252_v37, %v247_v38 }
  0x84   :  { %v259_v40 = vpop.permute.xlu0 %258  ;;  %v684_v5 = vpop.permute.xlu1 %683 }
  0x85   :  { %v261_v41 = vadd.f32 %v259_v40, %v254_v39 }
  0x87   :  { %v278_v42 = vpack.c.bf16 %v261_v41, %v261_v41 }
  0x88   :  { %v669_v14 = vpop.permute.xlu0 %668 }
  0x89   :  { %1352 = vmatprep.subr.msk.bf16.mxu0 %vm344_vm14, %v278_v42  ;;  %v346_v43 = vsel %vm344_vm14, %v278_v42, 0  ;;  %v674_v12 = vpop.permute.xlu1 %673 }
  0x8a   :  { %1271 = vmatpush3.bf16.msra.mxu0 %v346_v43 }
  0x8c   :  { %v659_v21 = vpop.permute.xlu0 %658 }
  0x8d   :  { %1273 = vmatmul.mubr.msk.bf16.vlgmr.msra.gmra.mxu0 %vm319_vm3, %v1361_v44  ;;  %v664_v18 = vpop.permute.xlu1 %663 }
  0x8e   :  { %1276 = vmatprep.mubr.msk.bf16.mxu0 %vm319_vm3, %v1364_v45 }
  0x90   :  { %v649_v30 = vpop.permute.xlu0 %648 }
  0x91   :  { %v654_v27 = vpop.permute.xlu1 %653 }
  0x95   :  { %1277 = vmatmul.mubr.msk.bf16.gmra.mxu0 %vm319_vm3, %v1365_v46  ;;  %v644_v44 = vpop.permute.xlu1 %643 }
  0x96   :  { %1280 = vmatprep.mubr.msk.bf16.mxu0 %vm319_vm3, %v1368_v47 }
  0x9d   :  { %1281 = vmatmul.mubr.msk.bf16.gmra.mxu0 %vm319_vm3, %v1369_v48 }
  0x9e   :  { %1284 = vmatprep.mubr.msk.bf16.mxu0 %vm319_vm3, %v1372_v49 }
  0xa5   :  { %1285 = vmatmul.mubr.msk.bf16.gmra.mxu0 %vm319_vm3, %v1373_v50  ;;  %v639_v50 = vpop.permute.xlu0 %638 }
  0xa6   :  { %1336 = vmatprep.mubr.bf16.mxu0 %v1374_v51 }
 0x10d   :  { %v1846_v52 = vpop.f32.mrf.mxu1 }
 0x10f   :  { %v1848_v53 = vpop.f32.mrf.mxu1 }
 0x111   :  { %v1850_v54 = vpop.f32.mrf.mxu1 }
 0x113   :  { %v1852_v55 = vpop.f32.mrf.mxu1 }
 0x115   :  { %v1854_v56 = vpop.f32.mrf.mxu1 }
 0x117   :  { %v1856_v57 = vpop.f32.mrf.mxu1 }
 0x119   :  { %v1311_v58 = vpop.f32.mrf.mxu1 }
 0x11b   :  { %v1858_v59 = vpop.f32.mrf.mxu1 }
 0x11d   :  { %v1314_v62 = vpop.f32.mrf.mxu1 }
 0x11f   :  { %v559_v2 = vpop.f32.mrf.mxu1 }
 0x121   :  { %v1315_v8 = vpop.f32.mrf.mxu1 }
 0x123   :  { %v562_v11 = vpop.f32.mrf.mxu1 }
 0x125   :  { %v1318_v16 = vpop.f32.mrf.mxu1 }
 0x127   :  { %v575_v19 = vpop.f32.mrf.mxu1 }
 0x129   :  { %v1319_v24 = vpop.f32.mrf.mxu1 }
 0x12b   :  { %v578_v34 = vpop.f32.mrf.mxu1 }
 0x14d   :  { %v1860_v60 = vpop.f32.mrf.mxu0 }
 0x14f   :  { %v1862_v61 = vpop.f32.mrf.mxu0 }
 0x151   :  { %v1864_v0 = vpop.f32.mrf.mxu0 }
 0x153   :  { %v1866_v1 = vpop.f32.mrf.mxu0 }
 0x155   :  { %v1278_v3 = vpop.f32.mrf.mxu0 }
 0x157   :  { %v398_v7 = vpop.f32.mrf.mxu0 }
 0x159   :  { %v1279_v9 = vpop.f32.mrf.mxu0 }
 0x15a   :  { %v555_v51 = vadd.f32 %v1311_v58, %v1279_v9  ;;  %v544_v58 = vadd.f32 %v1856_v57, %v398_v7  ;;  %v531_v57 = vadd.f32 %v1852_v55, %v1866_v1 }
 0x15b   :  { %v401_v10 = vpop.f32.mrf.mxu0 }
 0x15d   :  { %v1282_v13 = vpop.f32.mrf.mxu0 }
 0x15e   :  { %v568_v33 = vadd.f32 %v1314_v62, %v1282_v13 }
 0x15f   :  { %v414_v15 = vpop.f32.mrf.mxu0 }
 0x160   :  { %v696_v45 = vadd.f32 %v659_v21, %v568_v33  ;;  %v560_v46 = vadd.f32 %v559_v2, %v414_v15 }
 0x161   :  { %v1283_v17 = vpop.f32.mrf.mxu0 }
 0x162   :  { %v571_v28 = vadd.f32 %v1315_v8, %v1283_v17  ;;  %v712_v13 = vmax.f32 %v696_v45, 0.0  ;;  %v629_v17 = vpop.permute.xlu0 %628 }
 0x163   :  { %v417_v20 = vpop.f32.mrf.mxu0 }
 0x164   :  { %v697_v39 = vadd.f32 %v664_v18, %v571_v28  ;;  %v563_v40 = vadd.f32 %v562_v11, %v417_v20  ;;  %v694_v11 = vadd.f32 %v649_v30, %v560_v46 }
 0x165   :  { %v1286_v22 = vpop.f32.mrf.mxu0 }
 0x166   :  { %v584_v23 = vadd.f32 %v1318_v16, %v1286_v22  ;;  %v695_v62 = vadd.f32 %v654_v27, %v563_v40  ;;  %v547_v16 = vadd.f32 %v1858_v59, %v401_v10  ;;  %v710_v9 = vmax.f32 %v694_v11, 0.0 }
 0x167   :  { %v430_v25 = vpop.f32.mrf.mxu0  ;;  %v536_v59 = vadd.f32 %v1846_v52, %v1860_v60  ;;  %v690_v22 = vadd.f32 %v629_v17, %v544_v58 }
 0x168   :  { %v576_v26 = vadd.f32 %v575_v19, %v430_v25  ;;  %v700_v31 = vadd.f32 %v679_v63, %v584_v23  ;;  %v713_v63 = vmax.f32 %v697_v39, 0.0  ;;  %v711_v2 = vmax.f32 %v695_v62, 0.0  ;;  %v619_v23 = vpop.permute.xlu0 %618 }
 0x169   :  { %v1287_v29 = vpop.f32.mrf.mxu0  ;;  %v539_v19 = vadd.f32 %v1850_v54, %v1864_v0  ;;  %v688_v54 = vadd.f32 %v619_v23, %v536_v59  ;;  %v528_v0 = vadd.f32 %v1848_v53, %v1862_v61  ;;  %v1375_v53 = vld [vmem:[%s1912_s7 + $0x8] sm:$0xff]   ;;  %v1376_v61 = vld [vmem:[%s1912_s7 + $0x10] sm:$0xff]  }
 0x16a   :  { %v587_v32 = vadd.f32 %v1319_v24, %v1287_v29  ;;  %v698_v36 = vadd.f32 %v669_v14, %v576_v26  ;;  %v716_v41 = vmax.f32 %v700_v31, 0.0  ;;  %v634_v14 = vpop.permute.xlu1 %633  ;;  %v739_v15 = vpack.c.bf16 %v713_v63, %v712_v13 }
 0x16b   :  { %v433_v35 = vpop.f32.mrf.mxu0  ;;  %v738_v20 = vpack.c.bf16 %v711_v2, %v710_v9  ;;  %v706_v26 = vmax.f32 %v690_v22, 0.0  ;;  %v704_v30 = vmax.f32 %v688_v54, 0.0 }
 0x16c   :  { %v701_v37 = vadd.f32 %v684_v5, %v587_v32  ;;  %v579_v38 = vadd.f32 %v578_v34, %v433_v35  ;;  %v714_v47 = vmax.f32 %v698_v36, 0.0  ;;  %v552_v5 = vadd.f32 %v1854_v56, %v1278_v3  ;;  %v609_v29 = vpop.permute.xlu0 %608  ;;  %v1377_v34 = vld [vmem:[%s1912_s7 + $0x18] sm:$0xff]   ;;  %v1378_v35 = vld [vmem:[%s1912_s7 + $0x20] sm:$0xff]   ;;  %v1379_v36 = vld [vmem:[%s1912_s7 + $0x28] sm:$0xff]  }
 0x16d   :  { %v691_v3 = vadd.f32 %v634_v14, %v547_v16  ;;  %v686_v31 = vadd.f32 %v609_v29, %v528_v0 }
 0x16e   :  { %v717_v42 = vmax.f32 %v701_v37, 0.0  ;;  %v699_v43 = vadd.f32 %v674_v12, %v579_v38  ;;  %v693_v12 = vadd.f32 %v644_v44, %v555_v51  ;;  %v692_v18 = vadd.f32 %v639_v50, %v552_v5  ;;  %v624_v21 = vpop.permute.xlu1 %623  ;;  %v1380_v37 = vld [vmem:[%s1912_s7 + $0x30] sm:$0xff]   ;;  %v1381_v38 = vld [vmem:[%s1912_s7 + $0x38] sm:$0xff]   ;;  %s1410_s7 = smov [#allocation3]  }
 0x16f   :  { %v689_v24 = vadd.f32 %v624_v21, %v539_v19  ;;  %v707_v7 = vmax.f32 %v691_v3, 0.0  ;;  %v702_v1 = vmax.f32 %v686_v31, 0.0  ;;  %s1156_s21 = sshll.u32 %s1410_s7, 4  ;;  %s1157_s21 = int_to_ptr.vmem [resolvable:$true] %s1156_s21 }
 0x170   :  { %v715_v48 = vmax.f32 %v699_v43, 0.0  ;;  %v741_v49 = vpack.c.bf16 %v717_v42, %v716_v41  ;;  %v709_v56 = vmax.f32 %v693_v12, 0.0  ;;  %v708_v10 = vmax.f32 %v692_v18, 0.0  ;;  %v761_v39 = vpop.permute.xlu0 %760  ;;  %s1386_s22 = scalar_lea.vmem %s1157_s21, 16  ;;  %s1390_s9 = scalar_lea.vmem %s1157_s21, 32 }
 0x171   :  { %v705_v28 = vmax.f32 %v689_v24, 0.0  ;;  %v736_v60 = vpack.c.bf16 %v707_v7, %v706_v26  ;;  %p1387_p0 = scmp.ne.s32.totalorder %s1157_s21, %s1386_s22  ;;  %p1391_p1 = scmp.lt.s32.totalorder %s1157_s21, %s1157_s21 }
 0x172   :  { %1320 = vmatprep.subr.bf16.mxu0 %v741_v49  ;;  %v740_v8 = vpack.c.bf16 %v715_v48, %v714_v47  ;;  %v737_v25 = vpack.c.bf16 %v709_v56, %v708_v10  ;;  %v614_v27 = vpop.permute.xlu1 %613  ;;  %p1392_p2 = scmp.lt.s32.totalorder %s1390_s9, %s1386_s22 }
 0x173   :  { %1321 = vmatpush3.bf16.msra.mxu0 %v741_v49  ;;  %v687_v52 = vadd.f32 %v614_v27, %v531_v57  ;;  %v735_v55 = vpack.c.bf16 %v705_v28, %v704_v30 }
 0x174   :  { %1322 = vmatprep.subr.bf16.mxu0 %v740_v8  ;;  %v771_v41 = vpop.permute.xlu0 %770  ;;  %p1393_p3 = por %p1392_p2, %p1391_p1 }
 0x175   :  { %v703_v32 = vmax.f32 %v687_v52, 0.0 }
 0x176   :  { %v766_v40 = vpop.permute.xlu1 %765  ;;  %p1394_p4 = pnand %p1393_p3, %p1387_p0 }
 0x177   :  { %1323 = vmatpush3.bf16.msra.mxu0 %v740_v8  ;;  %v734_v33 = vpack.c.bf16 %v703_v32, %v702_v1 }
 0x178   :  { %1324 = vmatprep.subr.bf16.mxu0 %v739_v15  ;;  %v1018_v43 = vpop.permute.xlu0 %1017 }
 0x17a   :  { %v776_v42 = vpop.permute.xlu1 %775 }
 0x17b   :  { %1325 = vmatpush3.bf16.msra.mxu0 %v739_v15 }
 0x17c   :  { %1326 = vmatprep.subr.bf16.mxu0 %v738_v20  ;;  %v781_v45 = vpop.permute.xlu0 %780 }
 0x17e   :  { %v1023_v44 = vpop.permute.xlu1 %1022 }
 0x17f   :  { %1327 = vmatpush3.bf16.msra.mxu0 %v738_v20 }
 0x180   :  { %1328 = vmatprep.subr.bf16.mxu0 %v737_v25  ;;  %v786_v47 = vpop.permute.xlu0 %785 }
 0x182   :  { %v1028_v46 = vpop.permute.xlu1 %1027 }
 0x183   :  { %1329 = vmatpush3.bf16.msra.mxu0 %v737_v25 }
 0x184   :  { %1330 = vmatprep.subr.bf16.mxu0 %v736_v60  ;;  %v791_v49 = vpop.permute.xlu0 %790 }
 0x186   :  { %v1033_v48 = vpop.permute.xlu1 %1032 }
 0x187   :  { %1331 = vmatpush3.bf16.msra.mxu0 %v736_v60 }
 0x188   :  { %1332 = vmatprep.subr.bf16.mxu0 %v735_v55  ;;  %v796_v51 = vpop.permute.xlu0 %795 }
 0x18a   :  { %v1038_v50 = vpop.permute.xlu1 %1037 }
 0x18b   :  { %1333 = vmatpush3.bf16.msra.mxu0 %v735_v55 }
 0x18c   :  { %1334 = vmatprep.subr.bf16.mxu0 %v734_v33  ;;  %v801_v62 = vpop.permute.xlu0 %800 }
 0x18e   :  { %v1043_v63 = vpop.permute.xlu1 %1042 }
 0x18f   :  { %1335 = vmatpush3.bf16.msra.mxu0 %v734_v33 }
 0x190   :  { %v806_v5 = vpop.permute.xlu0 %805 }
 0x192   :  { %1337 = vmatmul.mubr.bf16.vlgmr.msra.gmra.mxu0 %v1375_v53  ;;  %v1048_v8 = vpop.permute.xlu1 %1047 }
 0x193   :  { %1340 = vmatprep.mubr.bf16.mxu0 %v1376_v61 }
 0x194   :  { %v811_v11 = vpop.permute.xlu0 %810 }
 0x196   :  { %v1053_v13 = vpop.permute.xlu1 %1052 }
 0x198   :  { %v816_v18 = vpop.permute.xlu0 %815 }
 0x19a   :  { %1341 = vmatmul.mubr.bf16.gmra.mxu0 %v1377_v34  ;;  %v1058_v12 = vpop.permute.xlu1 %1057 }
 0x19b   :  { %1344 = vmatprep.mubr.bf16.mxu0 %v1378_v35 }
 0x19c   :  { %v821_v7 = vpop.permute.xlu0 %820 }
 0x19e   :  { %v1063_v3 = vpop.permute.xlu1 %1062 }
 0x1a0   :  { %v826_v61 = vpop.permute.xlu0 %825 }
 0x1a2   :  { %1345 = vmatmul.mubr.bf16.gmra.mxu0 %v1379_v36  ;;  %v1068_v28 = vpop.permute.xlu1 %1067 }
 0x1a3   :  { %1348 = vmatprep.mubr.bf16.mxu0 %v1380_v37 }
 0x1aa   :  { %1349 = vmatmul.mubr.bf16.gmra.mxu0 %v1381_v38 }
 0x252   :  { %v1338_v14 = vpop.f32.mrf.mxu0 }
 0x253   :  { %v929_v17 = vadd.f32 %v1338_v14, %v771_v41 }
 0x254   :  { %v920_v16 = vpop.f32.mrf.mxu0 }
 0x255   :  { %v921_v2 = vadd.f32 %v920_v16, %v761_v39  ;;  %v985_v21 = vmax.f32 %v929_v17, 0.0  ;;  %v1073_v39 = vpop.permute.xlu1 %1072 }
 0x256   :  { %v1339_v15 = vpop.f32.mrf.mxu0 }
 0x257   :  { %v983_v9 = vmax.f32 %v921_v2, 0.0  ;;  %v932_v19 = vadd.f32 %v1339_v15, %v776_v42  ;;  %v1097_v54 = vmul.f32 %v1028_v46, %v985_v21 }
 0x258   :  { %v923_v58 = vpop.f32.mrf.mxu0 }
 0x259   :  { %v924_v56 = vadd.f32 %v923_v58, %v766_v40  ;;  %v1095_v22 = vmul.f32 %v1018_v43, %v983_v9  ;;  %v986_v23 = vmax.f32 %v932_v19, 0.0  ;;  %v1078_v17 = vpop.permute.xlu1 %1077 }
 0x25a   :  { %v1342_v20 = vpop.f32.mrf.mxu0 }
 0x25b   :  { %v984_v59 = vmax.f32 %v924_v56, 0.0  ;;  %v945_v26 = vadd.f32 %v1342_v20, %v791_v49  ;;  %v1098_v60 = vmul.f32 %v1033_v48, %v986_v23 }
 0x25c   :  { %v936_v10 = vpop.f32.mrf.mxu0 }
 0x25d   :  { %v1096_v24 = vmul.f32 %v1023_v44, %v984_v59  ;;  %v937_v57 = vadd.f32 %v936_v10, %v781_v45  ;;  %v989_v55 = vmax.f32 %v945_v26, 0.0 }
 0x25e   :  { %v1343_v25 = vpop.f32.mrf.mxu0 }
 0x25f   :  { %v1111_v0 = vadd.f32 %v1096_v24, %v1095_v22  ;;  %v987_v27 = vmax.f32 %v937_v57, 0.0  ;;  %v948_v30 = vadd.f32 %v1343_v25, %v796_v51  ;;  %v1101_v41 = vmul.f32 %v1048_v8, %v989_v55 }
 0x260   :  { %v939_v52 = vpop.f32.mrf.mxu0 }
 0x261   :  { %v1112_v29 = vadd.f32 %v1111_v0, %v1097_v54  ;;  %v940_v31 = vadd.f32 %v939_v52, %v786_v47  ;;  %v1099_v1 = vmul.f32 %v1038_v50, %v987_v27  ;;  %v990_v36 = vmax.f32 %v948_v30, 0.0  ;;  %v831_v50 = vpop.permute.xlu0 %830 }
 0x262   :  { %v1346_v32 = vpop.f32.mrf.mxu0 }
 0x263   :  { %v1113_v33 = vadd.f32 %v1112_v29, %v1098_v60  ;;  %v988_v53 = vmax.f32 %v940_v31, 0.0  ;;  %v961_v43 = vadd.f32 %v1346_v32, %v811_v11  ;;  %v1102_v46 = vmul.f32 %v1053_v13, %v990_v36 }
 0x264   :  { %v952_v34 = vpop.f32.mrf.mxu0 }
 0x265   :  { %v1114_v35 = vadd.f32 %v1113_v33, %v1099_v1  ;;  %v1100_v37 = vmul.f32 %v1043_v63, %v988_v53  ;;  %v953_v38 = vadd.f32 %v952_v34, %v801_v62  ;;  %v993_v14 = vmax.f32 %v961_v43, 0.0  ;;  %v836_v21 = vpop.permute.xlu0 %835 }
 0x266   :  { %v1347_v40 = vpop.f32.mrf.mxu0 }
 0x267   :  { %v1115_v42 = vadd.f32 %v1114_v35, %v1100_v37  ;;  %v991_v44 = vmax.f32 %v953_v38, 0.0  ;;  %v964_v48 = vadd.f32 %v1347_v40, %v816_v18  ;;  %v1105_v11 = vmul.f32 %v1068_v28, %v993_v14 }
 0x268   :  { %v955_v45 = vpop.f32.mrf.mxu0 }
 0x269   :  { %v1116_v47 = vadd.f32 %v1115_v42, %v1101_v41  ;;  %v956_v49 = vadd.f32 %v955_v45, %v806_v5  ;;  %v1103_v16 = vmul.f32 %v1058_v12, %v991_v44  ;;  %v994_v58 = vmax.f32 %v964_v48, 0.0  ;;  %v1083_v12 = vpop.permute.xlu1 %1082 }
 0x26a   :  { %v1350_v51 = vpop.f32.mrf.mxu0 }
 0x26b   :  { %v1117_v2 = vadd.f32 %v1116_v47, %v1102_v46  ;;  %v992_v15 = vmax.f32 %v956_v49, 0.0  ;;  %v977_v20 = vadd.f32 %v1350_v51, %v831_v50  ;;  %v1106_v5 = vmul.f32 %v1073_v39, %v994_v58 }
 0x26c   :  { %v968_v63 = vpop.f32.mrf.mxu0 }
 0x26d   :  { %v1118_v62 = vadd.f32 %v1117_v2, %v1103_v16  ;;  %v1104_v9 = vmul.f32 %v1063_v3, %v992_v15  ;;  %v969_v8 = vadd.f32 %v968_v63, %v821_v7  ;;  %v997_v23 = vmax.f32 %v977_v20, 0.0  ;;  %v1088_v7 = vpop.permute.xlu0 %1087  ;;  %v1093_v28 = vpop.permute.xlu1 %1092 }
 0x26e   :  { %v1351_v19 = vpop.f32.mrf.mxu0 }
 0x26f   :  { %v1119_v56 = vadd.f32 %v1118_v62, %v1104_v9  ;;  %v995_v13 = vmax.f32 %v969_v8, 0.0  ;;  %v980_v10 = vadd.f32 %v1351_v19, %v836_v21  ;;  %v1109_v26 = vmul.f32 %v1088_v7, %v997_v23 }
 0x270   :  { %v971_v18 = vpop.f32.mrf.mxu0 }
 0x271   :  { %v1120_v59 = vadd.f32 %v1119_v56, %v1105_v11  ;;  %v972_v22 = vadd.f32 %v971_v18, %v826_v61  ;;  %v1107_v24 = vmul.f32 %v1078_v17, %v995_v13  ;;  %v998_v0 = vmax.f32 %v980_v10, 0.0  ;;  %v1136_v1 = vpop.permute.xlu0 %1135 }
 0x272   :  { %v1141_v53 = vrot.slane %v1136_v1, %v62_v6 }
 0x273   :  { %v1121_v57 = vadd.f32 %v1120_v59, %v1106_v5  ;;  %v996_v25 = vmax.f32 %v972_v22, 0.0  ;;  %v1110_v52 = vmul.f32 %v1093_v28, %v998_v0 }
 0x275   :  { %v1122_v54 = vadd.f32 %v1121_v57, %v1107_v24  ;;  %v1108_v3 = vmul.f32 %v1083_v12, %v996_v25 }
 0x277   :  { %v1123_v27 = vadd.f32 %v1122_v54, %v1108_v3 }
 0x279   :  { %v1124_v60 = vadd.f32 %v1123_v27, %v1109_v26 }
 0x27b   :  { %v1125_v29 = vadd.f32 %v1124_v60, %v1110_v52 }
 0x27d   :  { %v1126_v30 = vrot.slane %v1125_v29, 4 }
 0x27f   :  { %v1127_v31 = vadd.f32 %v1126_v30, %v1125_v29 }
 0x281   :  { %v1128_v32 = vrot.slane %v1127_v31, 2 }
 0x283   :  { %v1129_v55 = vadd.f32 %v1128_v32, %v1127_v31 }
 0x285   :  { %v1130_v33 = vrot.slane %v1129_v55, 1 }
 0x287   :  { %v1131_v61 = vadd.f32 %v1130_v33, %v1129_v55 }
 0x289   :  { %v1142_v34 = vadd.f32 %v1141_v53, %v1131_v61 }
 0x28b   :  { %v1228_v35 = vmul.f32 -1.442695, %v1142_v34 }
 0x28d   :  { %1382 = vpow2.f32 %v1228_v35 }
 0x29a   :  { %v1383_v36 = vpop.eup %1382 }
 0x29b   :  { %v1146_v37 = vadd.f32 1.0, %v1383_v36 }
 0x29d   :  { %1384 = vrcp.f32 %v1146_v37 }
 0x2aa   :  { %v1385_v38 = vpop.eup %1384 }
 0x2ab   :  { %1149 = vst [vmem:[#allocation3] sm:$0x1] %v1385_v38 }
 0x2ac   :  { %1397 = shalt.err (!%p1394_p4)
}
 0x2ad   :  { %1159 = dma.vmem_to_hbm [thread:$0]  %s1157_s21, 16, %s1916_s11, [#allocation4]  }
 0x2ae   :  { %1406 = dma.done.wait [#allocation4], 16  }
 0x2af   :  { %1407 = vsyncadd [#allocation4], 4294967280 }
 0x2b0   :  { %1163 = vsyncpa [#allocation4], 1 }

</bundles_post_ra>
